<compile_context>
chip_gen: v6e
topology: v6e:2x2x1
jax: 0.10.0
libtpu: 0.0.40
codegen_flags: <defaults>
</compile_context>

<pallas_src>
import jax
import jax.numpy as jnp
from jax import lax
from jax.experimental import pallas as pl
from jax.experimental.pallas import tpu as pltpu

TAU = 2.0
V_TH = 1.0
DECAY = 1.0 - 1.0 / TAU   # LIF leak after folding 1/tau into weights/shift


def _mlp_lif_kernel(x_ref, w1_ref, b1_ref, w2_ref, b2_ref, o_ref, h_ref):
    # x_ref : (T, C_in, tl)       channels on sublanes, spatial on lanes
    # w1_ref: (C_hid, C_in) bf16  w2_ref: (C_out, C_hid) bf16  (BN*1/tau folded)
    # b1_ref: (C_hid, 1) f32      b2_ref: (C_out, 1) f32       (shift/tau)
    # o_ref : (T, C_out, tl) bf16 spikes
    # h_ref : (T, C_hid, tl) f32  VMEM scratch for the hoisted conv1+BN1
    T = x_ref.shape[0]
    tl = x_ref.shape[-1]
    c_hid = w1_ref.shape[0]
    c_out = w2_ref.shape[0]

    w1 = w1_ref[...]
    w2 = w2_ref[...]
    # Hoist the lane-broadcast of the per-channel shifts out of the time loops
    # (JAX does not CSE broadcast_in_dim inside loops).
    b1 = jnp.broadcast_to(b1_ref[...], (c_hid, tl))
    b2 = jnp.broadcast_to(b2_ref[...], (c_out, tl))

    # ---- phase 1: conv1 (1x1) + folded BN1 for every timestep (no temporal
    # dependence) -> the T matmuls stream back-to-back on the MXU.
    @pl.loop(0, T, unroll=True)
    def _(t):
        x = x_ref[t].astype(jnp.bfloat16)                      # no-op if x is bf16
        h_ref[t] = jnp.dot(w1, x, preferred_element_type=jnp.float32) + b1

    # ---- phase 2: recurrent LIF1 -> conv2 -> LIF2, carries stay in vregs.
    def step(t, carry):
        v1, v2 = carry

        # LIF1: v = v*(1 - 1/tau) + input/tau ; spike ; select-based hard reset
        v1 = v1 * DECAY + h_ref[t]
        fire1 = v1 >= V_TH
        sp1 = fire1.astype(jnp.bfloat16)                       # exact {0,1}
        v1 = jnp.where(fire1, 0.0, v1)

        # conv2 (1x1) + folded BN2
        g = jnp.dot(w2, sp1, preferred_element_type=jnp.float32) + b2

        # LIF2
        v2 = v2 * DECAY + g
        fire2 = v2 >= V_TH
        v2 = jnp.where(fire2, 0.0, v2)

        o_ref[t] = fire2.astype(o_ref.dtype)
        return (v1, v2)

    # T is small for SNNs; unroll so the LLO scheduler sees the whole loop.
    lax.fori_loop(
        0, T, step,
        (jnp.zeros((c_hid, tl), jnp.float32),
         jnp.zeros((c_out, tl), jnp.float32)),
        unroll=True)


def _vmem_capacity_bytes():
    """Per-TensorCore VMEM capacity; conservative fallback if the query fails."""
    try:
        cap = getattr(pltpu.get_tpu_info(), "vmem_capacity_bytes", None)
        if cap:
            return int(cap)
    except Exception:
        pass
    return 64 * 1024 * 1024          # v7x per-core VMEM (most restrictive)


def _vmem_block_bytes(T, c_in, c_hid, c_out, tl, x_bytes, out_bytes=2, w_bytes=2):
    x_blk = T * c_in * tl * x_bytes          # input block
    o_blk = T * c_out * tl * out_bytes       # output block (bf16 spikes)
    h_scr = T * c_hid * tl * 4               # conv1 scratch (single-buffered)
    params = (c_hid * c_in + c_out * c_hid) * w_bytes + (c_hid + c_out) * 4
    return 2 * (x_blk + o_blk) + h_scr + 2 * params


def _pick_spatial_tile(hw_pad, batch, T, c_in, c_hid, c_out, x_bytes, budget,
                       *, min_total_blocks=8, max_tl=2048):
    """Largest lane-aligned divisor of hw_pad that respects vreg pressure,
    the VMEM budget, and still yields enough independent grid blocks."""
    divisors = [d for d in range(128, hw_pad + 1, 128) if hw_pad % d == 0]
    # vreg-pressure cap: the two f32 membrane carries must stay well inside the
    # 64 x 4 KiB vreg file -> (c_hid + c_out) * tl * 4 <= ~96 KiB.
    vreg_cap = max(128, ((96 * 1024) // ((c_hid + c_out) * 4)) // 128 * 128)
    cap = min(max_tl, vreg_cap)
    cands = [d for d in divisors if d <= cap] or [divisors[0]]
    tl = max(cands)
    # shrink until the double-buffered blocks fit the VMEM budget
    while (_vmem_block_bytes(T, c_in, c_hid, c_out, tl, x_bytes) > budget
           and any(d < tl for d in cands)):
        tl = max(d for d in cands if d < tl)
    # shrink (down to 128) until there are enough independent grid blocks to
    # feed both v7x TensorCores and to hide DMA prefetch/writeback
    while batch * (hw_pad // tl) < min_total_blocks and any(d < tl for d in cands):
        tl = max(d for d in cands if d < tl)
    return tl


def mlp_forward(x, params, *, spatial_tile=None):
    """x: (T, B, C, H, W) float32 or bfloat16.
    Returns a (T, B, C_out, H, W) bfloat16 {0,1} spike tensor."""
    T, B, C, H, W = x.shape
    w1, b1, w2, b2 = params
    c_hid = w1.shape[0]
    c_out = w2.shape[0]
    hw = H * W
    x_bytes = jnp.dtype(x.dtype).itemsize

    # (T,B,C,H,W) -> (T,B,C,H*W): free reshape (no transpose, no extra HBM pass).
    xr = x.reshape(T, B, C, hw)

    # Pad the spatial dim to a multiple of 128 so every store is lane-dense
    # (unmasked vst); padded lanes are discarded at the end.
    hw_pad = pl.cdiv(hw, 128) * 128
    if hw_pad != hw:
        xr = jnp.pad(xr, ((0, 0), (0, 0), (0, 0), (0, hw_pad - hw)))

    # Per-generation VMEM budget (v7x: 64 MiB physical -> ~38 MiB of blocks;
    # v5e/v6e: 128 MiB physical -> larger blocks allowed).
    budget = int(_vmem_capacity_bytes() * 0.6)

    if spatial_tile is not None:
        tl = spatial_tile
    else:
        tl = _pick_spatial_tile(hw_pad, B, T, C, c_hid, c_out, x_bytes, budget)
    assert hw_pad % tl == 0 and tl % 128 == 0, (
        "spatial tile must be a multiple of 128 dividing the padded H*W")

    vmem_est = _vmem_block_bytes(T, C, c_hid, c_out, tl, x_bytes)
    assert vmem_est < budget, (
        f"block too large for this device's VMEM ({vmem_est} >= {budget}); "
        "pass a smaller spatial_tile")
    vmem_limit = min(budget, max(int(vmem_est * 1.3), 16 * 1024 * 1024))

    grid = (B, hw_pad // tl)

    out = pl.pallas_call(
        _mlp_lif_kernel,
        out_shape=jax.ShapeDtypeStruct((T, B, c_out, hw_pad), jnp.bfloat16),
        grid_spec=pltpu.PrefetchScalarGridSpec(
            num_scalar_prefetch=0,
            grid=grid,
            in_specs=[
                # whole time axis per block; batch dim squeezed out of the ref
                pl.BlockSpec((T, None, C, tl), lambda b, s: (0, b, 0, s)),
                pl.BlockSpec((c_hid, C), lambda b, s: (0, 0)),       # W1 (folded)
                pl.BlockSpec((c_hid, 1), lambda b, s: (0, 0)),       # shift1
                pl.BlockSpec((c_out, c_hid), lambda b, s: (0, 0)),   # W2 (folded)
                pl.BlockSpec((c_out, 1), lambda b, s: (0, 0)),       # shift2
            ],
            out_specs=pl.BlockSpec((T, None, c_out, tl),
                                   lambda b, s: (0, b, 0, s)),
            scratch_shapes=[pltpu.VMEM((T, c_hid, tl), jnp.float32)],
        ),
        compiler_params=pltpu.CompilerParams(
            # no cross-grid carry (T is inside the block) -> both axes parallel,
            # so v7x's two TensorCores get independent blocks.
            dimension_semantics=("parallel", "parallel"),
            vmem_limit_bytes=vmem_limit),
    )(xr, w1.astype(jnp.bfloat16), b1, w2.astype(jnp.bfloat16), b2)

    if hw_pad != hw:
        out = out[..., :hw]
    return out.reshape(T, B, c_out, H, W)


def make_params(key, in_features, hidden_features, out_features, eps=1e-5):
    """Synthetic conv+BN params, folded (BN eval-mode stats and 1/tau) into W/shift."""
    ks = jax.random.split(key, 10)

    def fold(w, b, gamma, beta, mean, var):
        # y = gamma * (W@x + b - mean) / sqrt(var+eps) + beta  == W'@x + shift
        scale = gamma / jnp.sqrt(var + eps)                     # (Cout,)
        shift = beta + (b - mean) * scale                       # (Cout,)
        w_f = (w * scale[:, None]) / TAU                        # fold 1/tau too
        s_f = shift / TAU
        return w_f.astype(jnp.float32), s_f[:, None].astype(jnp.float32)

    # conv1: weight (hidden, in), bias (hidden)
    w1 = jax.random.normal(ks[0], (hidden_features, in_features), jnp.float32) * 0.1
    b1 = jax.random.normal(ks[1], (hidden_features,), jnp.float32) * 0.1
    g1 = 1.0 + 0.1 * jax.random.normal(ks[2], (hidden_features,), jnp.float32)
    be1 = 0.1 * jax.random.normal(ks[3], (hidden_features,), jnp.float32)
    m1 = 0.1 * jax.random.normal(ks[4], (hidden_features,), jnp.float32)
    v1 = jnp.abs(jax.random.normal(ks[5], (hidden_features,), jnp.float32)) + 0.5

    # conv2: weight (out, hidden), bias (out)
    w2 = jax.random.normal(ks[6], (out_features, hidden_features), jnp.float32) * 0.1
    b2 = jax.random.normal(ks[7], (out_features,), jnp.float32) * 0.1
    g2 = 1.0 + 0.1 * jax.random.normal(ks[8], (out_features,), jnp.float32)
    be2 = 0.1 * jax.random.normal(ks[9], (out_features,), jnp.float32)
    m2 = jnp.zeros((out_features,), jnp.float32)
    v2 = jnp.ones((out_features,), jnp.float32)

    W1, S1 = fold(w1, b1, g1, be1, m1, v1)
    W2, S2 = fold(w2, b2, g2, be2, m2, v2)
    return (W1, S1, W2, S2)


def mlp_reference(x, params):
    """Pure-JAX reference (same bf16 matmul operands as the kernel)."""
    T, B, C, H, W = x.shape
    w1, b1, w2, b2 = params
    c_hid, c_out = w1.shape[0], w2.shape[0]
    hw = H * W
    xr = x.reshape(T, B, C, hw)
    w1b, w2b = w1.astype(jnp.bfloat16), w2.astype(jnp.bfloat16)

    def step(carry, xt):                                   # xt: (B, C, hw)
        v1, v2 = carry
        h = jnp.einsum('oc,bcn->bon', w1b, xt.astype(jnp.bfloat16),
                       preferred_element_type=jnp.float32) + b1[None]
        v1 = v1 * DECAY + h
        sp1 = (v1 >= V_TH).astype(jnp.float32)
        v1 = jnp.where(v1 >= V_TH, 0.0, v1)
        g = jnp.einsum('oc,bcn->bon', w2b, sp1.astype(jnp.bfloat16),
                       preferred_element_type=jnp.float32) + b2[None]
        v2 = v2 * DECAY + g
        sp2 = (v2 >= V_TH).astype(jnp.float32)
        v2 = jnp.where(v2 >= V_TH, 0.0, v2)
        return (v1, v2), sp2

    init = (jnp.zeros((B, c_hid, hw), jnp.float32),
            jnp.zeros((B, c_out, hw), jnp.float32))
    _, out = lax.scan(step, init, xr)
    return out.reshape(T, B, c_out, H, W)


if __name__ == "__main__":
    T, B, C, H, W = 4, 2, 16, 16, 16     # H*W = 256 -> lane-dense blocks
    hidden = 32
    out_features = C                      # module default: out_features = in_features

    key = jax.random.PRNGKey(0)
    k_x, k_p = jax.random.split(key)
    x = jax.random.normal(k_x, (T, B, C, H, W), jnp.float32)
    params = make_params(k_p, C, hidden, out_features)

    y = mlp_forward(x, params)
    jax.block_until_ready(y)

    assert y.shape == (T, B, out_features, H, W)
    # spikes must be exactly {0, 1}
    assert bool(jnp.all((y == 0.0) | (y == 1.0)))
    # compare against pure-JAX reference; allow a tiny threshold-flip fraction
    y_ref = mlp_reference(x, params)
    mismatch = float(jnp.mean(jnp.abs(y.astype(jnp.float32) - y_ref)))
    assert mismatch < 5e-3, f"spike mismatch fraction too high: {mismatch}"

    print("KERNEL_OK")
</pallas_src>

<mosaic_0001>
module attributes {stable_mosaic.version = 11 : i64} {
  func.func @_mlp_lif_kernel(%arg0: i32, %arg1: i32, %arg2: memref<4x1x16x128xf32, #tpu.memory_space<vmem>>, %arg3: memref<32x16xbf16, #tpu.memory_space<vmem>>, %arg4: memref<32x1xf32, #tpu.memory_space<vmem>>, %arg5: memref<16x32xbf16, #tpu.memory_space<vmem>>, %arg6: memref<16x1xf32, #tpu.memory_space<vmem>>, %arg7: memref<4x1x16x128xbf16, #tpu.memory_space<vmem>>, %arg8: memref<4x32x128xf32, #tpu.memory_space<vmem>>) attributes {dimension_semantics = [#tpu.dimension_semantics<parallel>, #tpu.dimension_semantics<parallel>], iteration_bounds = array<i64: 2, 2>, scalar_prefetch = 0 : i64, scratch_operands = 1 : i64, tpu.core_type = #tpu.core_type<tc>, window_params = [{transform_indices = @transform_0, window_bounds = array<i64: 4, 1, 16, 128>}, {pipeline_mode = #tpu.pipeline_mode<synchronous>, transform_indices = @transform_1, window_bounds = array<i64: 32, 16>}, {pipeline_mode = #tpu.pipeline_mode<synchronous>, transform_indices = @transform_2, window_bounds = array<i64: 32, 1>}, {pipeline_mode = #tpu.pipeline_mode<synchronous>, transform_indices = @transform_3, window_bounds = array<i64: 16, 32>}, {pipeline_mode = #tpu.pipeline_mode<synchronous>, transform_indices = @transform_4, window_bounds = array<i64: 16, 1>}, {transform_indices = @transform_5, window_bounds = array<i64: 4, 1, 16, 128>}]} {
    %c0 = arith.constant 0 : index
    %c0_0 = arith.constant 0 : index
    %0 = vector.load %arg3[%c0, %c0_0] : memref<32x16xbf16, #tpu.memory_space<vmem>>, vector<32x16xbf16>
    %c0_1 = arith.constant 0 : index
    %c0_2 = arith.constant 0 : index
    %1 = vector.load %arg5[%c0_1, %c0_2] : memref<16x32xbf16, #tpu.memory_space<vmem>>, vector<16x32xbf16>
    %c0_3 = arith.constant 0 : index
    %c0_4 = arith.constant 0 : index
    %2 = vector.load %arg4[%c0_3, %c0_4] : memref<32x1xf32, #tpu.memory_space<vmem>>, vector<32x1xf32>
    %3 = vector.shape_cast %2 : vector<32x1xf32> to vector<32x1xf32>
    %4 = vector.broadcast %3 : vector<32x1xf32> to vector<32x128xf32>
    %c0_5 = arith.constant 0 : index
    %c0_6 = arith.constant 0 : index
    %5 = vector.load %arg6[%c0_5, %c0_6] : memref<16x1xf32, #tpu.memory_space<vmem>>, vector<16x1xf32>
    %6 = vector.shape_cast %5 : vector<16x1xf32> to vector<16x1xf32>
    %7 = vector.broadcast %6 : vector<16x1xf32> to vector<16x128xf32>
    %c0_i32 = arith.constant 0 : i32
    %c1_i32 = arith.constant 1 : i32
    %8 = arith.muli %c0_i32, %c1_i32 : i32
    %c0_i32_7 = arith.constant 0 : i32
    %9 = arith.addi %c0_i32_7, %8 : i32
    %10 = arith.index_cast %9 : i32 to index
    %c0_8 = arith.constant 0 : index
    %c0_9 = arith.constant 0 : index
    %c0_10 = arith.constant 0 : index
    %11 = vector.load %arg2[%10, %c0_8, %c0_9, %c0_10] : memref<4x1x16x128xf32, #tpu.memory_space<vmem>>, vector<1x1x16x128xf32>
    %12 = vector.shape_cast %11 : vector<1x1x16x128xf32> to vector<16x128xf32>
    %13 = arith.truncf %12 : vector<16x128xf32> to vector<16x128xbf16>
    %cst = arith.constant dense<0.000000e+00> : vector<32x128xf32>
    %14 = tpu.matmul %0, %13, %cst {dimension_numbers = #tpu.dot_dimension_numbers<[1], [0], [0], [1], [0, 0, 1, 1], [], []>} : vector<32x16xbf16>, vector<16x128xbf16>, vector<32x128xf32> -> vector<32x128xf32>
    %15 = arith.addf %14, %4 : vector<32x128xf32>
    %16 = arith.index_cast %9 : i32 to index
    %c0_11 = arith.constant 0 : index
    %c0_12 = arith.constant 0 : index
    %17 = vector.load %arg8[%16, %c0_11, %c0_12] : memref<4x32x128xf32, #tpu.memory_space<vmem>>, vector<1x32x128xf32>
    %18 = vector.shape_cast %17 : vector<1x32x128xf32> to vector<32x128xf32>
    %19 = vector.shape_cast %15 : vector<32x128xf32> to vector<1x32x128xf32>
    tpu.vector_store %arg8[%16, %c0_11, %c0_12], %19 {strides = array<i32>} : memref<4x32x128xf32, #tpu.memory_space<vmem>>, vector<1x32x128xf32>,
    %c1_i32_13 = arith.constant 1 : i32
    %c1_i32_14 = arith.constant 1 : i32
    %20 = arith.muli %c1_i32_13, %c1_i32_14 : i32
    %c0_i32_15 = arith.constant 0 : i32
    %21 = arith.addi %c0_i32_15, %20 : i32
    %22 = arith.index_cast %21 : i32 to index
    %c0_16 = arith.constant 0 : index
    %c0_17 = arith.constant 0 : index
    %c0_18 = arith.constant 0 : index
    %23 = vector.load %arg2[%22, %c0_16, %c0_17, %c0_18] : memref<4x1x16x128xf32, #tpu.memory_space<vmem>>, vector<1x1x16x128xf32>
    %24 = vector.shape_cast %23 : vector<1x1x16x128xf32> to vector<16x128xf32>
    %25 = arith.truncf %24 : vector<16x128xf32> to vector<16x128xbf16>
    %cst_19 = arith.constant dense<0.000000e+00> : vector<32x128xf32>
    %26 = tpu.matmul %0, %25, %cst_19 {dimension_numbers = #tpu.dot_dimension_numbers<[1], [0], [0], [1], [0, 0, 1, 1], [], []>} : vector<32x16xbf16>, vector<16x128xbf16>, vector<32x128xf32> -> vector<32x128xf32>
    %27 = arith.addf %26, %4 : vector<32x128xf32>
    %28 = arith.index_cast %21 : i32 to index
    %c0_20 = arith.constant 0 : index
    %c0_21 = arith.constant 0 : index
    %29 = vector.load %arg8[%28, %c0_20, %c0_21] : memref<4x32x128xf32, #tpu.memory_space<vmem>>, vector<1x32x128xf32>
    %30 = vector.shape_cast %29 : vector<1x32x128xf32> to vector<32x128xf32>
    %31 = vector.shape_cast %27 : vector<32x128xf32> to vector<1x32x128xf32>
    tpu.vector_store %arg8[%28, %c0_20, %c0_21], %31 {strides = array<i32>} : memref<4x32x128xf32, #tpu.memory_space<vmem>>, vector<1x32x128xf32>,
    %c2_i32 = arith.constant 2 : i32
    %c1_i32_22 = arith.constant 1 : i32
    %32 = arith.muli %c2_i32, %c1_i32_22 : i32
    %c0_i32_23 = arith.constant 0 : i32
    %33 = arith.addi %c0_i32_23, %32 : i32
    %34 = arith.index_cast %33 : i32 to index
    %c0_24 = arith.constant 0 : index
    %c0_25 = arith.constant 0 : index
    %c0_26 = arith.constant 0 : index
    %35 = vector.load %arg2[%34, %c0_24, %c0_25, %c0_26] : memref<4x1x16x128xf32, #tpu.memory_space<vmem>>, vector<1x1x16x128xf32>
    %36 = vector.shape_cast %35 : vector<1x1x16x128xf32> to vector<16x128xf32>
    %37 = arith.truncf %36 : vector<16x128xf32> to vector<16x128xbf16>
    %cst_27 = arith.constant dense<0.000000e+00> : vector<32x128xf32>
    %38 = tpu.matmul %0, %37, %cst_27 {dimension_numbers = #tpu.dot_dimension_numbers<[1], [0], [0], [1], [0, 0, 1, 1], [], []>} : vector<32x16xbf16>, vector<16x128xbf16>, vector<32x128xf32> -> vector<32x128xf32>
    %39 = arith.addf %38, %4 : vector<32x128xf32>
    %40 = arith.index_cast %33 : i32 to index
    %c0_28 = arith.constant 0 : index
    %c0_29 = arith.constant 0 : index
    %41 = vector.load %arg8[%40, %c0_28, %c0_29] : memref<4x32x128xf32, #tpu.memory_space<vmem>>, vector<1x32x128xf32>
    %42 = vector.shape_cast %41 : vector<1x32x128xf32> to vector<32x128xf32>
    %43 = vector.shape_cast %39 : vector<32x128xf32> to vector<1x32x128xf32>
    tpu.vector_store %arg8[%40, %c0_28, %c0_29], %43 {strides = array<i32>} : memref<4x32x128xf32, #tpu.memory_space<vmem>>, vector<1x32x128xf32>,
    %c3_i32 = arith.constant 3 : i32
    %c1_i32_30 = arith.constant 1 : i32
    %44 = arith.muli %c3_i32, %c1_i32_30 : i32
    %c0_i32_31 = arith.constant 0 : i32
    %45 = arith.addi %c0_i32_31, %44 : i32
    %46 = arith.index_cast %45 : i32 to index
    %c0_32 = arith.constant 0 : index
    %c0_33 = arith.constant 0 : index
    %c0_34 = arith.constant 0 : index
    %47 = vector.load %arg2[%46, %c0_32, %c0_33, %c0_34] : memref<4x1x16x128xf32, #tpu.memory_space<vmem>>, vector<1x1x16x128xf32>
    %48 = vector.shape_cast %47 : vector<1x1x16x128xf32> to vector<16x128xf32>
    %49 = arith.truncf %48 : vector<16x128xf32> to vector<16x128xbf16>
    %cst_35 = arith.constant dense<0.000000e+00> : vector<32x128xf32>
    %50 = tpu.matmul %0, %49, %cst_35 {dimension_numbers = #tpu.dot_dimension_numbers<[1], [0], [0], [1], [0, 0, 1, 1], [], []>} : vector<32x16xbf16>, vector<16x128xbf16>, vector<32x128xf32> -> vector<32x128xf32>
    %51 = arith.addf %50, %4 : vector<32x128xf32>
    %52 = arith.index_cast %45 : i32 to index
    %c0_36 = arith.constant 0 : index
    %c0_37 = arith.constant 0 : index
    %53 = vector.load %arg8[%52, %c0_36, %c0_37] : memref<4x32x128xf32, #tpu.memory_space<vmem>>, vector<1x32x128xf32>
    %54 = vector.shape_cast %53 : vector<1x32x128xf32> to vector<32x128xf32>
    %55 = vector.shape_cast %51 : vector<32x128xf32> to vector<1x32x128xf32>
    tpu.vector_store %arg8[%52, %c0_36, %c0_37], %55 {strides = array<i32>} : memref<4x32x128xf32, #tpu.memory_space<vmem>>, vector<1x32x128xf32>,
    %c4_i32 = arith.constant 4 : i32
    %cst_38 = arith.constant 0.000000e+00 : f32
    %56 = vector.broadcast %cst_38 : f32 to vector<32x128xf32>
    %cst_39 = arith.constant 0.000000e+00 : f32
    %57 = vector.broadcast %cst_39 : f32 to vector<16x128xf32>
    %c0_i32_40 = arith.constant 0 : i32
    %cst_41 = arith.constant 5.000000e-01 : f32
    %58 = vector.broadcast %cst_41 : f32 to vector<32x128xf32>
    %59 = arith.mulf %56, %58 : vector<32x128xf32>
    %60 = arith.index_cast %c0_i32_40 : i32 to index
    %c0_42 = arith.constant 0 : index
    %c0_43 = arith.constant 0 : index
    %61 = vector.load %arg8[%60, %c0_42, %c0_43] : memref<4x32x128xf32, #tpu.memory_space<vmem>>, vector<1x32x128xf32>
    %62 = vector.shape_cast %61 : vector<1x32x128xf32> to vector<32x128xf32>
    %63 = arith.addf %59, %62 : vector<32x128xf32>
    %cst_44 = arith.constant 1.000000e+00 : f32
    %64 = vector.broadcast %cst_44 : f32 to vector<32x128xf32>
    %65 = arith.cmpf oge, %63, %64 : vector<32x128xf32>
    %66 = arith.extui %65 : vector<32x128xi1> to vector<32x128xi32>
    %67 = arith.sitofp %66 : vector<32x128xi32> to vector<32x128xf32>
    %68 = arith.truncf %67 : vector<32x128xf32> to vector<32x128xbf16>
    %cst_45 = arith.constant 0.000000e+00 : f32
    %69 = vector.broadcast %cst_45 : f32 to vector<32x128xf32>
    %70 = arith.select %65, %69, %63 : vector<32x128xi1>, vector<32x128xf32>
    %cst_46 = arith.constant dense<0.000000e+00> : vector<16x128xf32>
    %71 = tpu.matmul %1, %68, %cst_46 {dimension_numbers = #tpu.dot_dimension_numbers<[1], [0], [0], [1], [0, 0, 1, 1], [], []>} : vector<16x32xbf16>, vector<32x128xbf16>, vector<16x128xf32> -> vector<16x128xf32>
    %72 = arith.addf %71, %7 : vector<16x128xf32>
    %cst_47 = arith.constant 5.000000e-01 : f32
    %73 = vector.broadcast %cst_47 : f32 to vector<16x128xf32>
    %74 = arith.mulf %57, %73 : vector<16x128xf32>
    %75 = arith.addf %74, %72 : vector<16x128xf32>
    %cst_48 = arith.constant 1.000000e+00 : f32
    %76 = vector.broadcast %cst_48 : f32 to vector<16x128xf32>
    %77 = arith.cmpf oge, %75, %76 : vector<16x128xf32>
    %cst_49 = arith.constant 0.000000e+00 : f32
    %78 = vector.broadcast %cst_49 : f32 to vector<16x128xf32>
    %79 = arith.select %77, %78, %75 : vector<16x128xi1>, vector<16x128xf32>
    %80 = arith.extui %77 : vector<16x128xi1> to vector<16x128xi32>
    %81 = arith.sitofp %80 : vector<16x128xi32> to vector<16x128xf32>
    %82 = arith.truncf %81 : vector<16x128xf32> to vector<16x128xbf16>
    %83 = arith.index_cast %c0_i32_40 : i32 to index
    %c0_50 = arith.constant 0 : index
    %c0_51 = arith.constant 0 : index
    %c0_52 = arith.constant 0 : index
    %84 = vector.load %arg7[%83, %c0_50, %c0_51, %c0_52] : memref<4x1x16x128xbf16, #tpu.memory_space<vmem>>, vector<1x1x16x128xbf16>
    %85 = vector.shape_cast %84 : vector<1x1x16x128xbf16> to vector<16x128xbf16>
    %86 = vector.shape_cast %82 : vector<16x128xbf16> to vector<1x1x16x128xbf16>
    tpu.vector_store %arg7[%83, %c0_50, %c0_51, %c0_52], %86 {strides = array<i32>} : memref<4x1x16x128xbf16, #tpu.memory_space<vmem>>, vector<1x1x16x128xbf16>,
    %c1_i32_53 = arith.constant 1 : i32
    %cst_54 = arith.constant 5.000000e-01 : f32
    %87 = vector.broadcast %cst_54 : f32 to vector<32x128xf32>
    %88 = arith.mulf %70, %87 : vector<32x128xf32>
    %89 = arith.index_cast %c1_i32_53 : i32 to index
    %c0_55 = arith.constant 0 : index
    %c0_56 = arith.constant 0 : index
    %90 = vector.load %arg8[%89, %c0_55, %c0_56] : memref<4x32x128xf32, #tpu.memory_space<vmem>>, vector<1x32x128xf32>
    %91 = vector.shape_cast %90 : vector<1x32x128xf32> to vector<32x128xf32>
    %92 = arith.addf %88, %91 : vector<32x128xf32>
    %cst_57 = arith.constant 1.000000e+00 : f32
    %93 = vector.broadcast %cst_57 : f32 to vector<32x128xf32>
    %94 = arith.cmpf oge, %92, %93 : vector<32x128xf32>
    %95 = arith.extui %94 : vector<32x128xi1> to vector<32x128xi32>
    %96 = arith.sitofp %95 : vector<32x128xi32> to vector<32x128xf32>
    %97 = arith.truncf %96 : vector<32x128xf32> to vector<32x128xbf16>
    %cst_58 = arith.constant 0.000000e+00 : f32
    %98 = vector.broadcast %cst_58 : f32 to vector<32x128xf32>
    %99 = arith.select %94, %98, %92 : vector<32x128xi1>, vector<32x128xf32>
    %cst_59 = arith.constant dense<0.000000e+00> : vector<16x128xf32>
    %100 = tpu.matmul %1, %97, %cst_59 {dimension_numbers = #tpu.dot_dimension_numbers<[1], [0], [0], [1], [0, 0, 1, 1], [], []>} : vector<16x32xbf16>, vector<32x128xbf16>, vector<16x128xf32> -> vector<16x128xf32>
    %101 = arith.addf %100, %7 : vector<16x128xf32>
    %cst_60 = arith.constant 5.000000e-01 : f32
    %102 = vector.broadcast %cst_60 : f32 to vector<16x128xf32>
    %103 = arith.mulf %79, %102 : vector<16x128xf32>
    %104 = arith.addf %103, %101 : vector<16x128xf32>
    %cst_61 = arith.constant 1.000000e+00 : f32
    %105 = vector.broadcast %cst_61 : f32 to vector<16x128xf32>
    %106 = arith.cmpf oge, %104, %105 : vector<16x128xf32>
    %cst_62 = arith.constant 0.000000e+00 : f32
    %107 = vector.broadcast %cst_62 : f32 to vector<16x128xf32>
    %108 = arith.select %106, %107, %104 : vector<16x128xi1>, vector<16x128xf32>
    %109 = arith.extui %106 : vector<16x128xi1> to vector<16x128xi32>
    %110 = arith.sitofp %109 : vector<16x128xi32> to vector<16x128xf32>
    %111 = arith.truncf %110 : vector<16x128xf32> to vector<16x128xbf16>
    %112 = arith.index_cast %c1_i32_53 : i32 to index
    %c0_63 = arith.constant 0 : index
    %c0_64 = arith.constant 0 : index
    %c0_65 = arith.constant 0 : index
    %113 = vector.load %arg7[%112, %c0_63, %c0_64, %c0_65] : memref<4x1x16x128xbf16, #tpu.memory_space<vmem>>, vector<1x1x16x128xbf16>
    %114 = vector.shape_cast %113 : vector<1x1x16x128xbf16> to vector<16x128xbf16>
    %115 = vector.shape_cast %111 : vector<16x128xbf16> to vector<1x1x16x128xbf16>
    tpu.vector_store %arg7[%112, %c0_63, %c0_64, %c0_65], %115 {strides = array<i32>} : memref<4x1x16x128xbf16, #tpu.memory_space<vmem>>, vector<1x1x16x128xbf16>,
    %c2_i32_66 = arith.constant 2 : i32
    %cst_67 = arith.constant 5.000000e-01 : f32
    %116 = vector.broadcast %cst_67 : f32 to vector<32x128xf32>
    %117 = arith.mulf %99, %116 : vector<32x128xf32>
    %118 = arith.index_cast %c2_i32_66 : i32 to index
    %c0_68 = arith.constant 0 : index
    %c0_69 = arith.constant 0 : index
    %119 = vector.load %arg8[%118, %c0_68, %c0_69] : memref<4x32x128xf32, #tpu.memory_space<vmem>>, vector<1x32x128xf32>
    %120 = vector.shape_cast %119 : vector<1x32x128xf32> to vector<32x128xf32>
    %121 = arith.addf %117, %120 : vector<32x128xf32>
    %cst_70 = arith.constant 1.000000e+00 : f32
    %122 = vector.broadcast %cst_70 : f32 to vector<32x128xf32>
    %123 = arith.cmpf oge, %121, %122 : vector<32x128xf32>
    %124 = arith.extui %123 : vector<32x128xi1> to vector<32x128xi32>
    %125 = arith.sitofp %124 : vector<32x128xi32> to vector<32x128xf32>
    %126 = arith.truncf %125 : vector<32x128xf32> to vector<32x128xbf16>
    %cst_71 = arith.constant 0.000000e+00 : f32
    %127 = vector.broadcast %cst_71 : f32 to vector<32x128xf32>
    %128 = arith.select %123, %127, %121 : vector<32x128xi1>, vector<32x128xf32>
    %cst_72 = arith.constant dense<0.000000e+00> : vector<16x128xf32>
    %129 = tpu.matmul %1, %126, %cst_72 {dimension_numbers = #tpu.dot_dimension_numbers<[1], [0], [0], [1], [0, 0, 1, 1], [], []>} : vector<16x32xbf16>, vector<32x128xbf16>, vector<16x128xf32> -> vector<16x128xf32>
    %130 = arith.addf %129, %7 : vector<16x128xf32>
    %cst_73 = arith.constant 5.000000e-01 : f32
    %131 = vector.broadcast %cst_73 : f32 to vector<16x128xf32>
    %132 = arith.mulf %108, %131 : vector<16x128xf32>
    %133 = arith.addf %132, %130 : vector<16x128xf32>
    %cst_74 = arith.constant 1.000000e+00 : f32
    %134 = vector.broadcast %cst_74 : f32 to vector<16x128xf32>
    %135 = arith.cmpf oge, %133, %134 : vector<16x128xf32>
    %cst_75 = arith.constant 0.000000e+00 : f32
    %136 = vector.broadcast %cst_75 : f32 to vector<16x128xf32>
    %137 = arith.select %135, %136, %133 : vector<16x128xi1>, vector<16x128xf32>
    %138 = arith.extui %135 : vector<16x128xi1> to vector<16x128xi32>
    %139 = arith.sitofp %138 : vector<16x128xi32> to vector<16x128xf32>
    %140 = arith.truncf %139 : vector<16x128xf32> to vector<16x128xbf16>
    %141 = arith.index_cast %c2_i32_66 : i32 to index
    %c0_76 = arith.constant 0 : index
    %c0_77 = arith.constant 0 : index
    %c0_78 = arith.constant 0 : index
    %142 = vector.load %arg7[%141, %c0_76, %c0_77, %c0_78] : memref<4x1x16x128xbf16, #tpu.memory_space<vmem>>, vector<1x1x16x128xbf16>
    %143 = vector.shape_cast %142 : vector<1x1x16x128xbf16> to vector<16x128xbf16>
    %144 = vector.shape_cast %140 : vector<16x128xbf16> to vector<1x1x16x128xbf16>
    tpu.vector_store %arg7[%141, %c0_76, %c0_77, %c0_78], %144 {strides = array<i32>} : memref<4x1x16x128xbf16, #tpu.memory_space<vmem>>, vector<1x1x16x128xbf16>,
    %c3_i32_79 = arith.constant 3 : i32
    %cst_80 = arith.constant 5.000000e-01 : f32
    %145 = vector.broadcast %cst_80 : f32 to vector<32x128xf32>
    %146 = arith.mulf %128, %145 : vector<32x128xf32>
    %147 = arith.index_cast %c3_i32_79 : i32 to index
    %c0_81 = arith.constant 0 : index
    %c0_82 = arith.constant 0 : index
    %148 = vector.load %arg8[%147, %c0_81, %c0_82] : memref<4x32x128xf32, #tpu.memory_space<vmem>>, vector<1x32x128xf32>
    %149 = vector.shape_cast %148 : vector<1x32x128xf32> to vector<32x128xf32>
    %150 = arith.addf %146, %149 : vector<32x128xf32>
    %cst_83 = arith.constant 1.000000e+00 : f32
    %151 = vector.broadcast %cst_83 : f32 to vector<32x128xf32>
    %152 = arith.cmpf oge, %150, %151 : vector<32x128xf32>
    %153 = arith.extui %152 : vector<32x128xi1> to vector<32x128xi32>
    %154 = arith.sitofp %153 : vector<32x128xi32> to vector<32x128xf32>
    %155 = arith.truncf %154 : vector<32x128xf32> to vector<32x128xbf16>
    %cst_84 = arith.constant 0.000000e+00 : f32
    %156 = vector.broadcast %cst_84 : f32 to vector<32x128xf32>
    %157 = arith.select %152, %156, %150 : vector<32x128xi1>, vector<32x128xf32>
    %cst_85 = arith.constant dense<0.000000e+00> : vector<16x128xf32>
    %158 = tpu.matmul %1, %155, %cst_85 {dimension_numbers = #tpu.dot_dimension_numbers<[1], [0], [0], [1], [0, 0, 1, 1], [], []>} : vector<16x32xbf16>, vector<32x128xbf16>, vector<16x128xf32> -> vector<16x128xf32>
    %159 = arith.addf %158, %7 : vector<16x128xf32>
    %cst_86 = arith.constant 5.000000e-01 : f32
    %160 = vector.broadcast %cst_86 : f32 to vector<16x128xf32>
    %161 = arith.mulf %137, %160 : vector<16x128xf32>
    %162 = arith.addf %161, %159 : vector<16x128xf32>
    %cst_87 = arith.constant 1.000000e+00 : f32
    %163 = vector.broadcast %cst_87 : f32 to vector<16x128xf32>
    %164 = arith.cmpf oge, %162, %163 : vector<16x128xf32>
    %cst_88 = arith.constant 0.000000e+00 : f32
    %165 = vector.broadcast %cst_88 : f32 to vector<16x128xf32>
    %166 = arith.select %164, %165, %162 : vector<16x128xi1>, vector<16x128xf32>
    %167 = arith.extui %164 : vector<16x128xi1> to vector<16x128xi32>
    %168 = arith.sitofp %167 : vector<16x128xi32> to vector<16x128xf32>
    %169 = arith.truncf %168 : vector<16x128xf32> to vector<16x128xbf16>
    %170 = arith.index_cast %c3_i32_79 : i32 to index
    %c0_89 = arith.constant 0 : index
    %c0_90 = arith.constant 0 : index
    %c0_91 = arith.constant 0 : index
    %171 = vector.load %arg7[%170, %c0_89, %c0_90, %c0_91] : memref<4x1x16x128xbf16, #tpu.memory_space<vmem>>, vector<1x1x16x128xbf16>
    %172 = vector.shape_cast %171 : vector<1x1x16x128xbf16> to vector<16x128xbf16>
    %173 = vector.shape_cast %169 : vector<16x128xbf16> to vector<1x1x16x128xbf16>
    tpu.vector_store %arg7[%170, %c0_89, %c0_90, %c0_91], %173 {strides = array<i32>} : memref<4x1x16x128xbf16, #tpu.memory_space<vmem>>, vector<1x1x16x128xbf16>,
    %c4_i32_92 = arith.constant 4 : i32
    return
  }
  func.func @transform_0(%arg0: i32, %arg1: i32) -> (i32, i32, i32, i32) {
    %c0_i32 = arith.constant 0 : i32
    %c0_i32_0 = arith.constant 0 : i32
    %c0_i32_1 = arith.constant 0 : i32
    return %c0_i32, %arg0, %c0_i32_0, %arg1 : i32, i32, i32, i32
  }
  func.func @transform_1(%arg0: i32, %arg1: i32) -> (i32, i32) {
    %c0_i32 = arith.constant 0 : i32
    %c0_i32_0 = arith.constant 0 : i32
    %c0_i32_1 = arith.constant 0 : i32
    return %c0_i32, %c0_i32_0 : i32, i32
  }
  func.func @transform_2(%arg0: i32, %arg1: i32) -> (i32, i32) {
    %c0_i32 = arith.constant 0 : i32
    %c0_i32_0 = arith.constant 0 : i32
    %c0_i32_1 = arith.constant 0 : i32
    return %c0_i32, %c0_i32_0 : i32, i32
  }
  func.func @transform_3(%arg0: i32, %arg1: i32) -> (i32, i32) {
    %c0_i32 = arith.constant 0 : i32
    %c0_i32_0 = arith.constant 0 : i32
    %c0_i32_1 = arith.constant 0 : i32
    return %c0_i32, %c0_i32_0 : i32, i32
  }
  func.func @transform_4(%arg0: i32, %arg1: i32) -> (i32, i32) {
    %c0_i32 = arith.constant 0 : i32
    %c0_i32_0 = arith.constant 0 : i32
    %c0_i32_1 = arith.constant 0 : i32
    return %c0_i32, %c0_i32_0 : i32, i32
  }
  func.func @transform_5(%arg0: i32, %arg1: i32) -> (i32, i32, i32, i32) {
    %c0_i32 = arith.constant 0 : i32
    %c0_i32_0 = arith.constant 0 : i32
    %c0_i32_1 = arith.constant 0 : i32
    return %c0_i32, %arg0, %c0_i32_0, %arg1 : i32, i32, i32, i32
  }
}

</mosaic_0001>

<bundles_post_ra>
// kernel: tpu_custom_call.1
= control target key start
LH: loop header
LB: loop body
LE: loop exit
PB: predicated region body
PF: predicated region fallthrough
CT: control target
= control target key end

     0   :  { %10 = vsyncpa [#allocation4], 0  ;;  %s1780_s0 = inlined_call_operand.hbm [shape: f32[4,2,16,256], index: 0, kind: input, shape index: {}]   ;;  %s1781_s1 = inlined_call_operand.vmem [shape: bf16[32,16], index: 1, kind: input, shape index: {}]   ;;  %s1782_s2 = inlined_call_operand.vmem [shape: f32[32,1], index: 2, kind: input, shape index: {}]   ;;  %s1783_s3 = inlined_call_operand.vmem [shape: bf16[16,32], index: 3, kind: input, shape index: {}]   ;;  %s1784_s4 = inlined_call_operand.vmem [shape: f32[16,1], index: 4, kind: input, shape index: {}]   ;;  %s1785_s5 = inlined_call_operand.hbm [shape: bf16[4,2,16,256], index: 5, kind: output, shape index: {}]  }
   0x1   :  { %12 = vsyncpa [#allocation4 + $0x1], 0 }
   0x2   :  { %13 = vsyncpa [#allocation5], 0 }
   0x3   :  { %15 = vsyncpa [#allocation5 + $0x1], 0  ;;  %s1495_s18 = smov 0   ;;  %s1497_s19 = smov 0  }
   0x4   :  { %s1499_s20 = smov 0   ;;  %s1501_s21 = smov 0  }
   0x5   :  { %s1503_s22 = smov 0   ;;  %s1505_s23 = smov 0  }
   0x6   :  { %s1507_s24 = smov 0   ;;  %s1509_s25 = smov 0  }
   0x7 LB: > { %1789 = sst [smem:[#allocation14_spill]] %s1442_s24  ;;  %s1073_s26 = sadd.s32 4294967295, %s1446_s25   ;;  %s1446_s25 = sphi %s1509_s25, %s21_s25   ;;  %s1442_s24 = sphi %s1507_s24, %s1800_s24   ;;  %s1438_s23 = sphi %s1505_s23, %s1805_s23   ;;  %s1434_s22 = sphi %s1503_s22, %s1798_s22   ;;  %s1430_s21 = sphi %s1501_s21, %s1804_s21   ;;  %s1426_s20 = sphi %s1499_s20, %s1803_s20   ;;  %s1422_s19 = sphi %s1497_s19, %s1802_s19   ;;  %s1418_s18 = sphi %s1495_s18, %s1801_s18  }
   0x8   : > { %s1074_s27 = sadd.s32 4294967294, %s1446_s25   ;;  %s30_s28 = sadd.s32 1, %s1438_s23 }
   0x9   : > { %p31_p0 = scmp.ge.s32.totalorder %s30_s28, 2  ;;  %s33_s29 = sadd.s32 1, %s1442_s24 }
   0xa   : > { %p49_p1 = scmp.ne.s32.totalorder %s1426_s20, %s1422_s19  ;;  %p50_p2 = scmp.eq.s32.totalorder %s1446_s25, 0 }
   0xb   : > { %s1807_s28 = smov (%p31_p0, %s30_s28), 0  ;;  %s1809_s29 = smov (!%p31_p0, %s33_s29), %s1442_s24 }
   0xc   : > { %1790 = sst [smem:[#allocation15_spill]] %s1807_s28  ;;  %s38_s30 = ssub.s32 %s1438_s23, %s1807_s28 }
   0xd   : > { %p1547_p3 = por %p50_p2, %p49_p1  ;;  %p35_p4 = scmp.ge.s32.totalorder %s1809_s29, 2 }
   0xe   : > { %p55_p5 = scmp.ne.s32.totalorder %s1422_s19, %s1418_s18  ;;  %p56_p6 = scmp.eq.s32.totalorder %s1073_s26, 0 }
   0xf   : > { %p165_p7 = scmp.eq.s32.totalorder %s1073_s26, 3  ;;  %s1811_s29 = smov (%p35_p4, %s1809_s29), 0 }
  0x10   : > { %1792 = sst [smem:[#allocation16_spill]] %s1811_s29  ;;  %p1555_p8 = por %p56_p6, %p55_p5 }
  0x11   : > { %p1559_p9 = por %p165_p7, %p49_p1  ;;  %s37_s9 = ssub.s32 %s1442_s24, %s1811_s29 }
  0x12   : > { %p171_p10 = scmp.eq.s32.totalorder %s1074_s27, 3  ;;  %s39_s10 = sor.u32 %s38_s30, %s37_s9 }
  0x13   : > { %s42_s11 = sadd.s32 1, %s1426_s20  ;;  %p40_p11 = scmp.eq.s32.totalorder %s39_s10, 0 }
  0x14   : > { %p1566_p12 = por %p171_p10, %p55_p5  ;;  %p1076_p13 = scmp.ge.s32.totalorder %s1446_s25, 4 }
  0x15   : > { %s1571_s13 = scalar_select %p40_p11, %s1426_s20, %s42_s11  }
  0x16   : > { %199 = sbr.rel (%p1076_p13) target bundleno = 42 (0x2a), region = 32 }
  0x17   : > { %1796 = sst [smem:[#allocation17_spill]] %s1571_s13 }
  0x1b   : > { %s203_s14 = sand.u32 1, %s1426_s20   ;;  %s1078_s15 = sshll.u32 %s1442_s24, 2 }
  0x1c   : > { %s1077_s16 = sshll.u32 %s203_s14, 6  ;;  %s212_s17 = sadd.s32 %s1438_s23, %s1078_s15 }
  0x1d   : > { %s1079_s26 = sshll.u32 %s212_s17, 7  ;;  %s207_s27 = scalar_lea.vmem [#allocation3], %s1077_s16 }
  0x1e   : > { %s227_s30 = sshll.u32 %s207_s27, 4  ;;  %s214_s28 = scalar_lea.hbm %s1780_s0, %s1079_s26  ;;  %s228_s30 = int_to_ptr.vmem [resolvable:$true] %s227_s30 }
  0x1f   : > { %s1268_s9 = scalar_select %p1547_p3, [#allocation0], [#allocation11] }
  0x20   : > { %s1448_s13 = smov 1024   ;;  %s1449_s24 = smov 256  }
  0x21   : > { %s219_s10 = sld [smem:[%s1268_s9]]   ;;  %s1450_s15 = smov 2  }
  0x22   : > { %1269 = sst [smem:[#allocation8]] (%p1547_p3), %s1448_s13  ;;  %s1451_s16 = smov 128  }
  0x23   : > { %1270 = sst [smem:[#allocation8 + $0x1]] (%p1547_p3), %s1449_s24  ;;  %s1452_s27 = smov 8  }
  0x24   : > { %1271 = sst [smem:[#allocation8 + $0x2]] (%p1547_p3), %s1450_s15  ;;  %s204_s26 = scalar_lea.sflag [#allocation4], %s203_s14 }
  0x25   : > { %1272 = sst [smem:[#allocation8 + $0x3]] (%p1547_p3), %s1449_s24  ;;  %s1453_s9 = smov 131072  }
  0x26   : > { %1273 = sst [smem:[#allocation8 + $0x4]] (%p1547_p3), %s1451_s16 }
  0x27   : > { %s1080_s17 = sshll.u32 %s219_s10, 26  ;;  %1274 = sst [smem:[#allocation8 + $0x5]] (%p1547_p3), %s1452_s27 }
  0x28   : > { %s1081_s29 = sadd.s32 134217728, %s1080_s17 }
  0x29   : > { %1275 = dma.general (%p1547_p3), %s214_s28, 1024, %s228_s30, %s204_s26, %s1453_s9, [#allocation8], %s1081_s29, 0  }
  0x2a PF: > { %p1082_p0 = scmp.ge.s32.totalorder %s1446_s25, 1  ;;  %p248_p1 = scmp.lt.s32.totalorder %s1446_s25, 5 }
  0x2c   : > { %p249_p2 = pnand %p1082_p0, %p248_p1 }
  0x2d   : > { %s1599_s24 = sand.u32 (!%p249_p2), 1, %s1422_s19  }
  0x2e   : > { %252 = sbr.rel (%p249_p2) target bundleno = 501 (0x1f5), region = 40  ;;  %s1083_s13 = sshll.u32 (!%p249_p2), %s1599_s24, 6 }
  0x2f   : > { %s255_s10 = scalar_lea.sflag (!%p249_p2), [#allocation4], %s1599_s24  ;;  %s258_s11 = scalar_lea.vmem (!%p249_p2), [#allocation3], %s1083_s13 }
  0x33   : > { %1409 = dma.done.wait (%p1555_p8), %s255_s10, 1024  }
  0x34   : > { %1411 = vsyncadd (%p1555_p8), %s255_s10, 4294966272  ;;  %v1454_v0 = vmov 0   ;;  %v328_v1 = vld [vmem:[%s258_s11] sm:$0xff]  ;;  %v329_v2 = vld [vmem:[%s258_s11 + $0x8] sm:$0xff]  ;;  %vm341_vm0 = vcmask 130048   ;;  %v1455_v21 = vmov 0.0  }
  0x35   : > { %1371 = vset.pattern.permute.xlu0 %v1454_v0  ;;  %1372 = vset.pattern.permute.xlu1 %v1454_v0  ;;  %v1089_v3 = vld [vmem:[%s258_s11 + $0x10] sm:$0xff]  ;;  %v330_v4 = vpack.c.bf16 %v329_v2, %v328_v1  ;;  %v1090_v5 = vld [vmem:[%s258_s11 + $0x18] sm:$0xff]  ;;  %v1373_v7 = vld [vmem:[%s1781_s1] sm:$0xff]   ;;  %vm1456_vm1 = vmmov 0   ;;  %v1457_v51 = vmov 1.0|1.0  }
  0x36   : > { %v404_v6 = vpack.c.bf16 %v1090_v5, %v1089_v3  ;;  %v1374_v8 = vld [vmem:[%s1781_s1 + $0x8] sm:$0xff]   ;;  %v1093_v9 = vld [vmem:[%s258_s11 + $0x20] sm:$0xff]  ;;  %v1097_v12 = vld [vmem:[%s258_s11 + $0x30] sm:$0xff]  ;;  %1214 = vmatprep.mubr.msk.bf16.mxu0 %vm341_vm0, %v1373_v7  ;;  %1220 = vmatprep.mubr.msk.bf16.mxu1 %vm341_vm0, %v1373_v7  ;;  %vm606_vm10 = vcmask 261120   ;;  %s1084_s30 = sshll.u32 %s1599_s24, 5  ;;  %s948_s15 = scalar_lea.sflag [#allocation5], %s1599_s24 }
  0x37   : > { %1212 = vmatprep.subr.bf16.mxu0 %v330_v4  ;;  %v1094_v10 = vld [vmem:[%s258_s11 + $0x28] sm:$0xff]  ;;  %v1098_v13 = vld [vmem:[%s258_s11 + $0x38] sm:$0xff]  ;;  %v294_v15 = vld [vmem:[%s1782_s2 + $0x10] sm:$0xff]  ;;  %s1719_s7 = scalar_lea.vmem [#allocation6], %s1084_s30 }
  0x38   : > { %1218 = vmatprep.subr.bf16.mxu1 %v404_v6  ;;  %1213 = vmatpush3.bf16.msra.mxu0 %v330_v4  ;;  %v462_v11 = vpack.c.bf16 %v1094_v10, %v1093_v9  ;;  %v520_v14 = vpack.c.bf16 %v1098_v13, %v1097_v12  ;;  %v292_v16 = vld [vmem:[%s1782_s2] sm:$0xff]  ;;  %v295_v17 = vld [vmem:[%s1782_s2 + $0x18] sm:$0xff]  ;;  %v293_v18 = vld [vmem:[%s1782_s2 + $0x8] sm:$0xff] }
  0x39   : > { %1219 = vmatpush3.bf16.msra.mxu1 %v404_v6  ;;  %308 = vperm.xlu0 %1371, %v294_v15   ;;  %v316_v19 = vld [vmem:[%s1784_s4] sm:$0xff]  ;;  %v317_v20 = vld [vmem:[%s1784_s4 + $0x8] sm:$0xff] }
  0x3a   : > { %1224 = vmatprep.subr.bf16.mxu0 %v462_v11  ;;  %1230 = vmatprep.subr.bf16.mxu1 %v520_v14  ;;  %v1676_v0 = vld [vmem:[%s1783_s3] sm:$0xff]  }
  0x3b   : > { %1215 = vmatmul.mubr.msk.bf16.vlgmr.msra.gmra.mxu0 %vm341_vm0, %v1374_v8  ;;  %298 = vperm.xlu1 %1372, %v292_v16  }
  0x3c   : > { %1221 = vmatmul.mubr.msk.bf16.vlgmr.msra.gmra.mxu1 %vm341_vm0, %v1374_v8  ;;  %1225 = vmatpush3.bf16.msra.mxu0 %v462_v11 }
  0x3d   : > { %1231 = vmatpush3.bf16.msra.mxu1 %v520_v14  ;;  %1226 = vmatprep.mubr.msk.bf16.mxu0 %vm341_vm0, %v1373_v7 }
  0x3e   : > { %1232 = vmatprep.mubr.msk.bf16.mxu1 %vm341_vm0, %v1373_v7  ;;  %313 = vperm.xlu0 %1371, %v295_v17  }
  0x3f   : > { %303 = vperm.xlu1 %1372, %v293_v18   ;;  %1236 = vmatprep.subr.bf16.mxu0 %v1455_v21 }
  0x40   : > { %1244 = vmatprep.subr.bf16.mxu1 %v1455_v21 }
  0x42   : > { %320 = vperm.xlu0 %1371, %v316_v19  }
  0x43   : > { %1227 = vmatmul.mubr.msk.bf16.vlgmr.msra.gmra.mxu0 %vm341_vm0, %v1374_v8  ;;  %325 = vperm.xlu1 %1372, %v317_v20  }
  0x44   : > { %1233 = vmatmul.mubr.msk.bf16.vlgmr.msra.gmra.mxu1 %vm341_vm0, %v1374_v8  ;;  %1240 = vmatprep.mubr.msk.bf16.mxu0 %vm1456_vm1, %v1455_v21 }
  0x45   : > { %1248 = vmatprep.mubr.msk.bf16.mxu1 %vm1456_vm1, %v1455_v21 }
  0xb4   : > { %v1645_v22 = vpop.permute.xlu0 %308 }
  0xb6   : > { %v1647_v23 = vpop.permute.xlu1 %298 }
  0xb9   : > { %v1651_v30 = vpop.permute.xlu0 %313 }
  0xba   : > { %v1656_v37 = vpop.permute.xlu1 %303 }
  0xfb   : > { %v1216_v24 = vpop.f32.mrf.mxu0 }
  0xfc   : > { %v391_v25 = vadd.f32 %v1216_v24, %v1645_v22  ;;  %v1222_v26 = vpop.f32.mrf.mxu1 }
  0xfd   : > { %v382_v27 = vpop.f32.mrf.mxu0  ;;  %v448_v34 = vadd.f32 %v1222_v26, %v1645_v22 }
  0xfe   : > { %vm585_vm2 = vcmp.ge.f32.partialorder %v391_v25, 1.0  ;;  %v383_v28 = vadd.f32 %v382_v27, %v1647_v23  ;;  %v439_v29 = vpop.f32.mrf.mxu1 }
  0xff   : > { %v599_v31 = vsel %vm585_vm2, 0.0, %v391_v25  ;;  %v1217_v32 = vpop.f32.mrf.mxu0  ;;  %v440_v39 = vadd.f32 %v439_v29, %v1647_v23 }
 0x100   : > { %v673_v33 = vmul.f32 0.5, %v599_v31  ;;  %vm583_vm3 = vcmp.ge.f32.partialorder %v383_v28, 1.0  ;;  %v394_v35 = vadd.f32 %v1217_v32, %v1651_v30  ;;  %v1223_v36 = vpop.f32.mrf.mxu1 }
 0x101   : > { %v597_v38 = vsel %vm583_vm3, 0.0, %v383_v28  ;;  %v385_v40 = vpop.f32.mrf.mxu0  ;;  %v451_v46 = vadd.f32 %v1223_v36, %v1651_v30 }
 0x102   : > { %v681_v41 = vadd.f32 %v673_v33, %v448_v34  ;;  %v671_v42 = vmul.f32 0.5, %v597_v38  ;;  %vm586_vm4 = vcmp.ge.f32.partialorder %v394_v35, 1.0  ;;  %v386_v43 = vadd.f32 %v385_v40, %v1656_v37  ;;  %v442_v44 = vpop.f32.mrf.mxu1 }
 0x103   : > { %v600_v45 = vsel %vm586_vm4, 0.0, %v394_v35  ;;  %vm1106_vm5 = vmpackc.low %vm586_vm4, %vm585_vm2  ;;  %v1228_v47 = vpop.f32.mrf.mxu0  ;;  %v443_v54 = vadd.f32 %v442_v44, %v1656_v37 }
 0x104   : > { %vm685_vm6 = vcmp.ge.f32.partialorder %v681_v41, 1.0  ;;  %v679_v48 = vadd.f32 %v671_v42, %v440_v39  ;;  %v674_v49 = vmul.f32 0.5, %v600_v45  ;;  %vm584_vm7 = vcmp.ge.f32.partialorder %v386_v43, 1.0  ;;  %v1234_v50 = vpop.f32.mrf.mxu1  ;;  %1237 = vmatpush3.bf16.msk.msra.mxu0 %vm1106_vm5, %v1457_v51 }
 0x105   : > { %v699_v52 = vsel %vm685_vm6, 0.0, %v681_v41  ;;  %v598_v53 = vsel %vm584_vm7, 0.0, %v386_v43  ;;  %v506_v55 = vadd.f32 %v1228_v47, %v1645_v22  ;;  %v497_v56 = vpop.f32.mrf.mxu0  ;;  %1238 = vmatprep.subr.bf16.mxu0 %v1455_v21  ;;  %vm1108_vm9 = vmpackc.low %vm584_vm7, %vm583_vm3  ;;  %v564_v17 = vadd.f32 %v1234_v50, %v1645_v22 }
 0x106   : > { %vm683_vm8 = vcmp.ge.f32.partialorder %v679_v48, 1.0  ;;  %v682_v57 = vadd.f32 %v674_v49, %v451_v46  ;;  %v672_v58 = vmul.f32 0.5, %v598_v53  ;;  %v767_v59 = vmul.f32 0.5, %v699_v52  ;;  %v555_v62 = vpop.f32.mrf.mxu1 }
 0x107   : > { %v697_v60 = vsel %vm683_vm8, 0.0, %v679_v48  ;;  %v498_v61 = vadd.f32 %v497_v56, %v1647_v23  ;;  %v1229_v63 = vpop.f32.mrf.mxu0  ;;  %v556_v22 = vadd.f32 %v555_v62, %v1647_v23  ;;  %v321_v23 = vpop.permute.xlu0 %320 }
 0x108   : > { %vm686_vm11 = vcmp.ge.f32.partialorder %v682_v57, 1.0  ;;  %v680_v1 = vadd.f32 %v672_v58, %v443_v54  ;;  %v775_v2 = vadd.f32 %v767_v59, %v506_v55  ;;  %v765_v3 = vmul.f32 0.5, %v697_v60  ;;  %1239 = vmatpush3.bf16.msk.msra.mxu0 %vm1108_vm9, %v1457_v51  ;;  %v1235_v11 = vpop.f32.mrf.mxu1 }
 0x109   : > { %v700_v4 = vsel %vm686_vm11, 0.0, %v682_v57  ;;  %vm1119_vm12 = vmpackc.low %vm686_vm11, %vm685_vm6  ;;  %v509_v5 = vadd.f32 %v1229_v63, %v1651_v30  ;;  %v500_v6 = vpop.f32.mrf.mxu0  ;;  %1252 = vmatprep.subr.bf16.mxu0 %v1455_v21  ;;  %v567_v20 = vadd.f32 %v1235_v11, %v1651_v30 }
 0x10a   : > { %vm684_vm13 = vcmp.ge.f32.partialorder %v680_v1, 1.0  ;;  %vm779_vm14 = vcmp.ge.f32.partialorder %v775_v2, 1.0  ;;  %v773_v7 = vadd.f32 %v765_v3, %v498_v61  ;;  %v768_v8 = vmul.f32 0.5, %v700_v4  ;;  %1245 = vmatpush3.bf16.msk.msra.mxu1 %vm1119_vm12, %v1457_v51  ;;  %v558_v24 = vpop.f32.mrf.mxu1 }
 0x10b   : > { %v698_v9 = vsel %vm684_vm13, 0.0, %v680_v1  ;;  %v793_v10 = vsel %vm779_vm14, 0.0, %v775_v2  ;;  %v501_v12 = vadd.f32 %v500_v6, %v1656_v37  ;;  %1241 = vmatmul.mubr.msk.bf16.vlgmr.msra.gmra.mxu0 %vm606_vm10, %v1676_v0  ;;  %1246 = vmatprep.subr.bf16.mxu1 %v1455_v21  ;;  %vm1121_vm0 = vmpackc.low %vm684_vm13, %vm683_vm8  ;;  %v559_v30 = vadd.f32 %v558_v24, %v1656_v37  ;;  %v326_v37 = vpop.permute.xlu1 %325 }
 0x10c   : > { %v861_v13 = vmul.f32 0.5, %v793_v10  ;;  %vm777_vm15 = vcmp.ge.f32.partialorder %v773_v7, 1.0  ;;  %v776_v14 = vadd.f32 %v768_v8, %v509_v5  ;;  %v766_v15 = vmul.f32 0.5, %v698_v9  ;;  %1256 = vmatprep.mubr.msk.bf16.mxu0 %vm1456_vm1, %v1455_v21 }
 0x10d   : > { %v791_v16 = vsel %vm777_vm15, 0.0, %v773_v7 }
 0x10e   : > { %vm780_vm2 = vcmp.ge.f32.partialorder %v776_v14, 1.0  ;;  %v774_v18 = vadd.f32 %v766_v15, %v501_v12  ;;  %1247 = vmatpush3.bf16.msk.msra.mxu1 %vm1121_vm0, %v1457_v51  ;;  %v869_v25 = vadd.f32 %v861_v13, %v564_v17  ;;  %v859_v26 = vmul.f32 0.5, %v791_v16 }
 0x10f   : > { %v794_v19 = vsel %vm780_vm2, 0.0, %v776_v14  ;;  %vm1134_vm3 = vmpackc.low %vm780_vm2, %vm779_vm14  ;;  %1260 = vmatprep.subr.bf16.mxu1 %v1455_v21 }
 0x110   : > { %v862_v27 = vmul.f32 0.5, %v794_v19  ;;  %vm778_vm4 = vcmp.ge.f32.partialorder %v774_v18, 1.0  ;;  %1253 = vmatpush3.bf16.msk.msra.mxu0 %vm1134_vm3, %v1457_v51  ;;  %vm873_vm6 = vcmp.ge.f32.partialorder %v869_v25, 1.0  ;;  %v867_v32 = vadd.f32 %v859_v26, %v556_v22 }
 0x111   : > { %v792_v28 = vsel %vm778_vm4, 0.0, %v774_v18  ;;  %1249 = vmatmul.mubr.msk.bf16.vlgmr.msra.gmra.mxu1 %vm606_vm10, %v1676_v0  ;;  %1254 = vmatprep.subr.bf16.mxu0 %v1455_v21  ;;  %vm1136_vm5 = vmpackc.low %vm778_vm4, %vm777_vm15 }
 0x112   : > { %v870_v29 = vadd.f32 %v862_v27, %v567_v20  ;;  %v860_v31 = vmul.f32 0.5, %v792_v28  ;;  %1264 = vmatprep.mubr.msk.bf16.mxu1 %vm1456_vm1, %v1455_v21  ;;  %vm871_vm11 = vcmp.ge.f32.partialorder %v867_v32, 1.0 }
 0x114   : > { %vm874_vm7 = vcmp.ge.f32.partialorder %v870_v29, 1.0  ;;  %v868_v33 = vadd.f32 %v860_v31, %v559_v30  ;;  %1255 = vmatpush3.bf16.msk.msra.mxu0 %vm1136_vm5, %v1457_v51 }
 0x115   : > { %vm1149_vm8 = vmpackc.low %vm874_vm7, %vm873_vm6 }
 0x116   : > { %vm872_vm9 = vcmp.ge.f32.partialorder %v868_v33, 1.0  ;;  %1261 = vmatpush3.bf16.msk.msra.mxu1 %vm1149_vm8, %v1457_v51 }
 0x117   : > { %1257 = vmatmul.mubr.msk.bf16.vlgmr.msra.gmra.mxu0 %vm606_vm10, %v1676_v0  ;;  %1262 = vmatprep.subr.bf16.mxu1 %v1455_v21  ;;  %vm1151_vm1 = vmpackc.low %vm872_vm9, %vm871_vm11 }
 0x11a   : > { %1263 = vmatpush3.bf16.msk.msra.mxu1 %vm1151_vm1, %v1457_v51 }
 0x11d   : > { %1265 = vmatmul.mubr.msk.bf16.vlgmr.msra.gmra.mxu1 %vm606_vm10, %v1676_v0 }
 0x1cb   : > { %v644_v34 = vpop.f32.mrf.mxu0 }
 0x1cc   : > { %v645_v35 = vadd.f32 %v644_v34, %v321_v23 }
 0x1cd   : > { %v1242_v36 = vpop.f32.mrf.mxu0 }
 0x1ce   : > { %vm653_vm12 = vcmp.ge.f32.partialorder %v645_v35, 1.0 }
 0x1cf   : > { %v655_v38 = vsel %vm653_vm12, 0.0, %v645_v35  ;;  %v647_v39 = vpop.f32.mrf.mxu0  ;;  %v1111_v45 = vsel %vm653_vm12, 1.0, %v1455_v21 }
 0x1d0   : > { %v648_v40 = vadd.f32 %v647_v39, %v326_v37  ;;  %v742_v43 = vmul.f32 0.5, %v655_v38 }
 0x1d1   : > { %v1243_v41 = vpop.f32.mrf.mxu0  ;;  %v735_v42 = vpop.f32.mrf.mxu1 }
 0x1d2   : > { %vm654_vm13 = vcmp.ge.f32.partialorder %v648_v40, 1.0  ;;  %v736_v44 = vadd.f32 %v735_v42, %v321_v23 }
 0x1d3   : > { %v656_v46 = vsel %vm654_vm13, 0.0, %v648_v40  ;;  %v1112_v47 = vsel %vm654_vm13, 1.0, %v1455_v21  ;;  %v1250_v48 = vpop.f32.mrf.mxu1 }
 0x1d4   : > { %v1174_v49 = vpack.c.bf16 %v1112_v47, %v1111_v45  ;;  %v744_v50 = vadd.f32 %v742_v43, %v736_v44  ;;  %v743_v52 = vmul.f32 0.5, %v656_v46 }
 0x1d5   : > { %v738_v51 = vpop.f32.mrf.mxu1 }
 0x1d6   : > { %1175 = vst [vmem:[%s1719_s7] sm:$0xff] %v1174_v49   ;;  %vm746_vm10 = vcmp.ge.f32.partialorder %v744_v50, 1.0  ;;  %v739_v53 = vadd.f32 %v738_v51, %v326_v37 }
 0x1d7   : > { %v748_v54 = vsel %vm746_vm10, 0.0, %v744_v50  ;;  %v1251_v55 = vpop.f32.mrf.mxu1  ;;  %v829_v56 = vpop.f32.mrf.mxu0  ;;  %v1124_v62 = vsel %vm746_vm10, 1.0, %v1455_v21 }
 0x1d8   : > { %v745_v57 = vadd.f32 %v743_v52, %v739_v53  ;;  %v830_v58 = vadd.f32 %v829_v56, %v321_v23  ;;  %v836_v59 = vmul.f32 0.5, %v748_v54 }
 0x1d9   : > { %v1258_v60 = vpop.f32.mrf.mxu0 }
 0x1da   : > { %vm747_vm14 = vcmp.ge.f32.partialorder %v745_v57, 1.0  ;;  %v838_v61 = vadd.f32 %v836_v59, %v830_v58 }
 0x1db   : > { %v749_v63 = vsel %vm747_vm14, 0.0, %v745_v57  ;;  %v1125_v0 = vsel %vm747_vm14, 1.0, %v1455_v21  ;;  %v832_v1 = vpop.f32.mrf.mxu0 }
 0x1dc   : > { %v1177_v2 = vpack.c.bf16 %v1125_v0, %v1124_v62  ;;  %vm840_vm15 = vcmp.ge.f32.partialorder %v838_v61, 1.0  ;;  %v833_v3 = vadd.f32 %v832_v1, %v326_v37  ;;  %v837_v4 = vmul.f32 0.5, %v749_v63 }
 0x1dd   : > { %v842_v5 = vsel %vm840_vm15, 0.0, %v838_v61  ;;  %v1259_v6 = vpop.f32.mrf.mxu0  ;;  %v919_v7 = vpop.f32.mrf.mxu1  ;;  %v1139_v13 = vsel %vm840_vm15, 1.0, %v1455_v21 }
 0x1de   : > { %1185 = vst [vmem:[%s1719_s7 + $0x8] sm:$0xff] %v1177_v2   ;;  %v839_v8 = vadd.f32 %v837_v4, %v833_v3  ;;  %v920_v9 = vadd.f32 %v919_v7, %v321_v23  ;;  %v926_v10 = vmul.f32 0.5, %v842_v5 }
 0x1df   : > { %v1266_v11 = vpop.f32.mrf.mxu1 }
 0x1e0   : > { %vm841_vm0 = vcmp.ge.f32.partialorder %v839_v8, 1.0  ;;  %v928_v12 = vadd.f32 %v926_v10, %v920_v9 }
 0x1e1   : > { %v843_v14 = vsel %vm841_vm0, 0.0, %v839_v8  ;;  %v1140_v15 = vsel %vm841_vm0, 1.0, %v1455_v21  ;;  %v922_v16 = vpop.f32.mrf.mxu1 }
 0x1e2   : > { %v1180_v17 = vpack.c.bf16 %v1140_v15, %v1139_v13  ;;  %v923_v18 = vadd.f32 %v922_v16, %v326_v37  ;;  %v927_v19 = vmul.f32 0.5, %v843_v14  ;;  %vm930_vm2 = vcmp.ge.f32.partialorder %v928_v12, 1.0 }
 0x1e3   : > { %v1267_v20 = vpop.f32.mrf.mxu1  ;;  %v1154_v25 = vsel %vm930_vm2, 1.0, %v1455_v21 }
 0x1e4   : > { %1186 = vst [vmem:[%s1719_s7 + $0x10] sm:$0xff] %v1180_v17   ;;  %v929_v24 = vadd.f32 %v927_v19, %v923_v18 }
 0x1e6   : > { %vm931_vm3 = vcmp.ge.f32.partialorder %v929_v24, 1.0 }
 0x1e7   : > { %v1155_v26 = vsel %vm931_vm3, 1.0, %v1455_v21 }
 0x1e8   : > { %v1183_v27 = vpack.c.bf16 %v1155_v26, %v1154_v25 }
 0x1ea   : > { %1187 = vst [vmem:[%s1719_s7 + $0x18] sm:$0xff] %v1183_v27  }
 0x1eb   : > { %s1161_s16 = sshll.u32 %s1434_s22, 2  ;;  %s972_s17 = sshll.u32 %s1719_s7, 4  ;;  %s973_s17 = int_to_ptr.vmem [resolvable:$true] %s972_s17 }
 0x1ec   : > { %s959_s27 = sadd.s32 %s1430_s21, %s1161_s16  ;;  %s1458_s24 = smov 128  }
 0x1ed   : > { %s1162_s29 = sshll.u32 %s959_s27, 6  ;;  %1277 = sst [smem:[#allocation10]] (%p1559_p9), %s1458_s24 }
 0x1ee   : > { %s961_s13 = scalar_lea.hbm %s1785_s5, %s1162_s29  ;;  %s1459_s10 = smov 512  }
 0x1ef   : > { %1278 = sst [smem:[#allocation10 + $0x1]] (%p1559_p9), %s1459_s10  ;;  %s1460_s11 = smov 2  }
 0x1f0   : > { %1279 = sst [smem:[#allocation10 + $0x2]] (%p1559_p9), %s1460_s11  ;;  %s1461_s22 = smov 64  }
 0x1f1   : > { %1280 = sst [smem:[#allocation10 + $0x3]] (%p1559_p9), %s1461_s22  ;;  %s1462_s21 = smov 4  }
 0x1f2   : > { %1281 = sst [smem:[#allocation10 + $0x4]] (%p1559_p9), %s1458_s24  ;;  %s1463_s28 = smov 131072  }
 0x1f3   : > { %1282 = sst [smem:[#allocation10 + $0x5]] (%p1559_p9), %s1462_s21  ;;  %s1464_s6 = smov 0  }
 0x1f4   : > { %1283 = dma.general (%p1559_p9), %s973_s17, 512, %s961_s13, %s948_s15, %s1463_s28, [#allocation10], %s1464_s6, 0  }
 0x1f5 PF: > { %p1289_p3 = scmp.ge.s32.totalorder %s1446_s25, 2  ;;  %s1000_s14 = sand.u32 1, %s1418_s18  }
 0x1f6   : > { %s1001_s30 = scalar_lea.sflag [#allocation5], %s1000_s14 }
 0x1f7   : > { %p1286_p4 = pnand %p1289_p3, %p1566_p12 }
 0x1f9   : > { %p1287_p5 = pneg %p1286_p4 }
 0x1fb   : > { %1413 = dma.done.wait (%p1287_p5), %s1001_s30, 512  }
 0x1fc   : > { %1415 = vsyncadd (%p1287_p5), %s1001_s30, 4294966784  ;;  %s21_s25 = sadd.s32 1, %s1446_s25   ;;  %s1797_s7 = sld [smem:[#allocation17_spill]] }
 0x1fd   : > { %p18_p6 = scmp.ge.s32.totalorder %s21_s25, 6   ;;  %s1798_s22 = sld [smem:[#allocation14_spill]] }
 0x1fe   : > { %s1799_s8 = sld [smem:[#allocation15_spill]]  ;;  %s1801_s18 = smov %s1422_s19 }
 0x1ff   : > { %s1800_s24 = sld [smem:[#allocation16_spill]]  ;;  %s1802_s19 = smov %s1426_s20 }
 0x200   : > { %s1804_s21 = smov %s1438_s23  ;;  %20 = sbr.rel (!%p18_p6) target bundleno = 7 (0x7), region = 104 }
 0x202   : > { %s1803_s20 = smov %s1797_s7 }
 0x204   : > { %s1805_s23 = smov %s1799_s8 }
 0x205   :  { %1006 = vsyncpa [#allocation4], 1 }
 0x206   :  { %1008 = vsyncpa [#allocation4 + $0x1], 1 }
 0x207   :  { %1009 = vsyncpa [#allocation5], 1 }
 0x208   :  { %1011 = vsyncpa [#allocation5 + $0x1], 1 }

</bundles_post_ra>
